<compile_context>
chip_gen: v5e
topology: v5e:2x2
jax: 0.10.0
libtpu: 0.0.40
codegen_flags: <defaults>
</compile_context>

<pallas_src>
import functools

import jax
import jax.numpy as jnp
from jax.experimental import pallas as pl
from jax.experimental.pallas import tpu as pltpu


def _attention_kernel(enc_ref, dec_ref, we_ref, be_ref, wd_ref, bd_ref,
                      wf_ref, bf_ref, awe_ref, alpha_ref):
    """One grid step handles a block of TB batch elements.

    Block shapes inside the kernel:
      enc_ref   : (TB, P, E)  encoder_out block
      dec_ref   : (TB, D)     decoder_hidden block
      we_ref    : (E, A)      encoder_att weight (pre-transposed)
      be_ref    : (1, A)      encoder_att bias
      wd_ref    : (D, A)      decoder_att weight (pre-transposed)
      bd_ref    : (1, A)      decoder_att bias
      wf_ref    : (1, A)      full_att weight as a row
      bf_ref    : (1,)        full_att bias (SMEM scalar)
      awe_ref   : (TB, E)     attention-weighted encoding output
      alpha_ref : (TB, P)     attention weights output (lane-dense in P)
    """
    tb, p, e = enc_ref.shape
    a = we_ref.shape[1]

    enc = enc_ref[...]                                   # (TB, P, E)

    # att1 = encoder_att(encoder_out): one big MXU matmul for the whole block.
    # (P is a multiple of 8 here so the merge/split of leading dims is a clean
    #  tile reinterpretation.)
    enc2d = enc.reshape(tb * p, e)                       # (TB*P, E)
    att1 = jnp.dot(enc2d, we_ref[...],
                   preferred_element_type=jnp.float32)   # (TB*P, A)
    att1 = att1.reshape(tb, p, a) + be_ref[...]          # (TB, P, A)

    # att2 = decoder_att(decoder_hidden): once per batch block (hoisted).
    att2 = jnp.dot(dec_ref[...], wd_ref[...],
                   preferred_element_type=jnp.float32) + bd_ref[...]   # (TB, A)

    # relu(att1 + att2.unsqueeze(1))  (broadcast over the pixel axis)
    h = jnp.maximum(att1 + att2[:, None, :], 0.0)        # (TB, P, A)

    # full_att(...): lane-major reduction against the (1, A) weight row instead
    # of a 1-output-column MXU matmul.  Result is (TB, P) with P on lanes.
    scores = jnp.sum(h * wf_ref[...], axis=-1) + bf_ref[0]   # (TB, P)

    # softmax over the num_pixels axis (lanes), numerically stabilized.
    m = jnp.max(scores, axis=-1, keepdims=True)          # (TB, 1)
    ex = jnp.exp(scores - m)                             # (TB, P)
    denom = jnp.sum(ex, axis=-1, keepdims=True)          # (TB, 1)
    alpha = ex * pl.reciprocal(denom, approx=False)      # exact: keep 1e-5 tol
    alpha_ref[...] = alpha                               # lane-dense store

    # (encoder_out * alpha.unsqueeze(2)).sum(dim=1) as a batched MXU matmul:
    # (TB, 1, P) @ (TB, P, E) -> (TB, 1, E)
    awe = jnp.einsum("bqp,bpe->bqe", alpha[:, None, :], enc,
                     preferred_element_type=jnp.float32)
    awe_ref[...] = awe[:, 0, :]                          # (TB, E), lane-dense


def _pick_batch_tile(batch, num_pixels):
    """Largest divisor of `batch` aiming at ~256 matmul rows per block while
    keeping >=2 grid steps (so v7x can shard blocks across its 2 TCs)."""
    target = max(1, 256 // max(num_pixels, 1))
    tb = min(batch, target)
    while batch % tb:
        tb -= 1
    if batch // tb < 2:
        for cand in range(tb - 1, 0, -1):
            if batch % cand == 0 and batch // cand >= 2:
                tb = cand
                break
    return tb


@functools.partial(jax.jit, static_argnames=("tb",))
def attention_forward(encoder_out, decoder_hidden, params, *, tb=None):
    """Pallas-backed forward pass.

    encoder_out   : (B, P, E) float32
    decoder_hidden: (B, D)    float32
    returns (attention_weighted_encoding (B, E), alpha (B, P))
    """
    we, be, wd, bd = params["we"], params["be"], params["wd"], params["bd"]
    wf, bf = params["wf"], params["bf"]
    B, P, E = encoder_out.shape
    D = decoder_hidden.shape[1]
    A = we.shape[1]

    if tb is None:
        tb = _pick_batch_tile(B, P)
    assert B % tb == 0, "batch must be divisible by the batch tile"

    wf_row = wf.reshape(1, A)          # (A, 1) -> (1, A) row for lane reduction
    bf_smem = bf.reshape(1)            # scalar bias -> SMEM

    # Explicit scoped-VMEM budget: double-buffered in/out blocks + resident
    # weights + intermediates, clamped well inside v7x's 64 MiB physical VMEM.
    est = 4 * (2 * tb * (P * E + D + E + P)     # pipelined input/output blocks
               + (E + D + 2) * A + 16           # resident weights / biases
               + 4 * tb * P * A)                # att1 / h intermediates
    vmem_limit = int(min(48 * 1024 * 1024, max(2 * est, 16 * 1024 * 1024)))

    awe, alpha = pl.pallas_call(
        _attention_kernel,
        out_shape=(
            jax.ShapeDtypeStruct((B, E), jnp.float32),
            jax.ShapeDtypeStruct((B, P), jnp.float32),
        ),
        grid_spec=pltpu.PrefetchScalarGridSpec(
            num_scalar_prefetch=0,
            grid=(B // tb,),
            in_specs=[
                pl.BlockSpec((tb, P, E), lambda b: (b, 0, 0)),   # encoder_out
                pl.BlockSpec((tb, D), lambda b: (b, 0)),         # decoder_hidden
                pl.BlockSpec((E, A), lambda b: (0, 0)),          # we
                pl.BlockSpec((1, A), lambda b: (0, 0)),          # be
                pl.BlockSpec((D, A), lambda b: (0, 0)),          # wd
                pl.BlockSpec((1, A), lambda b: (0, 0)),          # bd
                pl.BlockSpec((1, A), lambda b: (0, 0)),          # wf row
                pl.BlockSpec(memory_space=pltpu.MemorySpace.SMEM),  # bf scalar
            ],
            out_specs=[
                pl.BlockSpec((tb, E), lambda b: (b, 0)),         # awe
                pl.BlockSpec((tb, P), lambda b: (b, 0)),         # alpha
            ],
        ),
        compiler_params=pltpu.CompilerParams(
            dimension_semantics=("parallel",),
            vmem_limit_bytes=vmem_limit),
    )(encoder_out, decoder_hidden, we, be, wd, bd, wf_row, bf_smem)

    return awe, alpha


def init_params(key, encoder_dim, decoder_dim, attention_dim):
    """Deterministic init mimicking nn.Linear's uniform(-1/sqrt(fan_in), ...)."""
    k = jax.random.split(key, 6)

    def lin(kw, kb, fan_in, fan_out):
        bound = 1.0 / jnp.sqrt(fan_in)
        w = jax.random.uniform(kw, (fan_in, fan_out), jnp.float32, -bound, bound)
        b = jax.random.uniform(kb, (1, fan_out), jnp.float32, -bound, bound)
        return w, b

    we, be = lin(k[0], k[1], encoder_dim, attention_dim)
    wd, bd = lin(k[2], k[3], decoder_dim, attention_dim)
    wf, bf = lin(k[4], k[5], attention_dim, 1)
    return {"we": we, "be": be, "wd": wd, "bd": bd, "wf": wf, "bf": bf}


def reference_forward(encoder_out, decoder_hidden, p):
    """Plain-JAX reference matching the PyTorch forward exactly."""
    att1 = encoder_out @ p["we"] + p["be"][0]                  # (B, P, A)
    att2 = decoder_hidden @ p["wd"] + p["bd"][0]               # (B, A)
    att = (jnp.maximum(att1 + att2[:, None, :], 0.0) @ p["wf"])[..., 0] + p["bf"][0, 0]
    alpha = jax.nn.softmax(att, axis=1)                        # (B, P)
    awe = jnp.sum(encoder_out * alpha[:, :, None], axis=1)     # (B, E)
    return awe, alpha


if __name__ == "__main__":
    # Small but MXU-friendly demo shapes: batch tile of 8 x 16 pixels = 128
    # matmul rows per grid step, 2 parallel grid steps over the batch.
    B, P, E, D, A = 16, 16, 32, 32, 32

    key = jax.random.PRNGKey(0)
    k_enc, k_dec, k_par = jax.random.split(key, 3)
    encoder_out = jax.random.normal(k_enc, (B, P, E), jnp.float32)
    decoder_hidden = jax.random.normal(k_dec, (B, D), jnp.float32)
    params = init_params(k_par, E, D, A)

    awe, alpha = attention_forward(encoder_out, decoder_hidden, params)
    jax.block_until_ready((awe, alpha))

    awe_ref, alpha_ref = reference_forward(encoder_out, decoder_hidden, params)
    assert awe.shape == (B, E) and alpha.shape == (B, P)
    assert jnp.allclose(awe, awe_ref, atol=1e-5, rtol=1e-5)
    assert jnp.allclose(alpha, alpha_ref, atol=1e-5, rtol=1e-5)
    assert jnp.allclose(jnp.sum(alpha, axis=1), 1.0, atol=1e-5)

    print("KERNEL_OK")
</pallas_src>

<mosaic_0001>
module attributes {stable_mosaic.version = 11 : i64} {
  func.func @_attention_kernel(%arg0: i32, %arg1: memref<8x16x32xf32, #tpu.memory_space<vmem>>, %arg2: memref<8x32xf32, #tpu.memory_space<vmem>>, %arg3: memref<32x32xf32, #tpu.memory_space<vmem>>, %arg4: memref<1x32xf32, #tpu.memory_space<vmem>>, %arg5: memref<32x32xf32, #tpu.memory_space<vmem>>, %arg6: memref<1x32xf32, #tpu.memory_space<vmem>>, %arg7: memref<1x32xf32, #tpu.memory_space<vmem>>, %arg8: memref<1xf32, #tpu.memory_space<smem>>, %arg9: memref<8x32xf32, #tpu.memory_space<vmem>>, %arg10: memref<8x16xf32, #tpu.memory_space<vmem>>) attributes {dimension_semantics = [#tpu.dimension_semantics<parallel>], iteration_bounds = array<i64: 2>, scalar_prefetch = 0 : i64, scratch_operands = 0 : i64, tpu.core_type = #tpu.core_type<tc>, window_params = [{transform_indices = @transform_0, window_bounds = array<i64: 8, 16, 32>}, {transform_indices = @transform_1, window_bounds = array<i64: 8, 32>}, {pipeline_mode = #tpu.pipeline_mode<synchronous>, transform_indices = @transform_2, window_bounds = array<i64: 32, 32>}, {pipeline_mode = #tpu.pipeline_mode<synchronous>, transform_indices = @transform_3, window_bounds = array<i64: 1, 32>}, {pipeline_mode = #tpu.pipeline_mode<synchronous>, transform_indices = @transform_4, window_bounds = array<i64: 32, 32>}, {pipeline_mode = #tpu.pipeline_mode<synchronous>, transform_indices = @transform_5, window_bounds = array<i64: 1, 32>}, {pipeline_mode = #tpu.pipeline_mode<synchronous>, transform_indices = @transform_6, window_bounds = array<i64: 1, 32>}, {transform_indices = @transform_7, window_bounds = array<i64: 1>}, {transform_indices = @transform_8, window_bounds = array<i64: 8, 32>}, {transform_indices = @transform_9, window_bounds = array<i64: 8, 16>}]} {
    %c0 = arith.constant 0 : index
    %c0_0 = arith.constant 0 : index
    %c0_1 = arith.constant 0 : index
    %0 = vector.load %arg1[%c0, %c0_0, %c0_1] : memref<8x16x32xf32, #tpu.memory_space<vmem>>, vector<8x16x32xf32>
    %1 = vector.shape_cast %0 : vector<8x16x32xf32> to vector<128x32xf32>
    %c0_2 = arith.constant 0 : index
    %c0_3 = arith.constant 0 : index
    %2 = vector.load %arg3[%c0_2, %c0_3] : memref<32x32xf32, #tpu.memory_space<vmem>>, vector<32x32xf32>
    %cst = arith.constant dense<0.000000e+00> : vector<128x32xf32>
    %3 = tpu.matmul %1, %2, %cst {dimension_numbers = #tpu.dot_dimension_numbers<[1], [0], [0], [1], [0, 0, 1, 1], [], []>} : vector<128x32xf32>, vector<32x32xf32>, vector<128x32xf32> -> vector<128x32xf32>
    %4 = vector.shape_cast %3 : vector<128x32xf32> to vector<8x16x32xf32>
    %c0_4 = arith.constant 0 : index
    %c0_5 = arith.constant 0 : index
    %5 = vector.load %arg4[%c0_4, %c0_5] : memref<1x32xf32, #tpu.memory_space<vmem>>, vector<1x32xf32>
    %6 = vector.shape_cast %5 : vector<1x32xf32> to vector<1x1x32xf32>
    %7 = vector.broadcast %6 : vector<1x1x32xf32> to vector<8x16x32xf32>
    %8 = arith.addf %4, %7 : vector<8x16x32xf32>
    %c0_6 = arith.constant 0 : index
    %c0_7 = arith.constant 0 : index
    %9 = vector.load %arg2[%c0_6, %c0_7] : memref<8x32xf32, #tpu.memory_space<vmem>>, vector<8x32xf32>
    %c0_8 = arith.constant 0 : index
    %c0_9 = arith.constant 0 : index
    %10 = vector.load %arg5[%c0_8, %c0_9] : memref<32x32xf32, #tpu.memory_space<vmem>>, vector<32x32xf32>
    %cst_10 = arith.constant dense<0.000000e+00> : vector<8x32xf32>
    %11 = tpu.matmul %9, %10, %cst_10 {dimension_numbers = #tpu.dot_dimension_numbers<[1], [0], [0], [1], [0, 0, 1, 1], [], []>} : vector<8x32xf32>, vector<32x32xf32>, vector<8x32xf32> -> vector<8x32xf32>
    %c0_11 = arith.constant 0 : index
    %c0_12 = arith.constant 0 : index
    %12 = vector.load %arg6[%c0_11, %c0_12] : memref<1x32xf32, #tpu.memory_space<vmem>>, vector<1x32xf32>
    %13 = vector.broadcast %12 : vector<1x32xf32> to vector<8x32xf32>
    %14 = arith.addf %11, %13 : vector<8x32xf32>
    %15 = vector.shape_cast %14 : vector<8x32xf32> to vector<8x1x32xf32>
    %16 = vector.broadcast %15 : vector<8x1x32xf32> to vector<8x16x32xf32>
    %17 = arith.addf %8, %16 : vector<8x16x32xf32>
    %cst_13 = arith.constant 0.000000e+00 : f32
    %18 = vector.broadcast %cst_13 : f32 to vector<8x16x32xf32>
    %19 = arith.maximumf %17, %18 : vector<8x16x32xf32>
    %c0_14 = arith.constant 0 : index
    %c0_15 = arith.constant 0 : index
    %20 = vector.load %arg7[%c0_14, %c0_15] : memref<1x32xf32, #tpu.memory_space<vmem>>, vector<1x32xf32>
    %21 = vector.shape_cast %20 : vector<1x32xf32> to vector<1x1x32xf32>
    %22 = vector.broadcast %21 : vector<1x1x32xf32> to vector<8x16x32xf32>
    %23 = arith.mulf %19, %22 : vector<8x16x32xf32>
    %cst_16 = arith.constant dense<0.000000e+00> : vector<8x16xf32>
    %24 = vector.multi_reduction <add>, %23, %cst_16 [2] : vector<8x16x32xf32> to vector<8x16xf32>
    %c0_17 = arith.constant 0 : index
    %25 = memref.load %arg8[%c0_17] : memref<1xf32, #tpu.memory_space<smem>>
    %26 = vector.broadcast %25 : f32 to vector<8x16xf32>
    %27 = arith.addf %24, %26 : vector<8x16xf32>
    %cst_18 = arith.constant dense<0xFF800000> : vector<8xf32>
    %28 = vector.multi_reduction <maximumf>, %27, %cst_18 [1] : vector<8x16xf32> to vector<8xf32>
    %29 = vector.shape_cast %28 : vector<8xf32> to vector<8x1xf32>
    %30 = vector.broadcast %29 : vector<8x1xf32> to vector<8x16xf32>
    %31 = arith.subf %27, %30 : vector<8x16xf32>
    %32 = math.exp %31 : vector<8x16xf32>
    %cst_19 = arith.constant dense<0.000000e+00> : vector<8xf32>
    %33 = vector.multi_reduction <add>, %32, %cst_19 [1] : vector<8x16xf32> to vector<8xf32>
    %34 = vector.shape_cast %33 : vector<8xf32> to vector<8x1xf32>
    %35 = tpu.reciprocal %34 : vector<8x1xf32> -> vector<8x1xf32>
    %36 = vector.broadcast %35 : vector<8x1xf32> to vector<8x16xf32>
    %37 = arith.mulf %32, %36 : vector<8x16xf32>
    %c0_20 = arith.constant 0 : index
    %c0_21 = arith.constant 0 : index
    %38 = vector.load %arg10[%c0_20, %c0_21] : memref<8x16xf32, #tpu.memory_space<vmem>>, vector<8x16xf32>
    tpu.vector_store %arg10[%c0_20, %c0_21], %37 {strides = array<i32>} : memref<8x16xf32, #tpu.memory_space<vmem>>, vector<8x16xf32>,
    %39 = vector.shape_cast %37 : vector<8x16xf32> to vector<8x1x16xf32>
    "tpu.trace_start"() <{level = 10 : i32, message = "bqp,bpe->bqe"}> : () -> ()
    %cst_22 = arith.constant dense<0.000000e+00> : vector<8x1x32xf32>
    %40 = tpu.matmul %39, %0, %cst_22 {dimension_numbers = #tpu.dot_dimension_numbers<[2], [1], [1], [2], [0, 0, 0, 1, 1, 2], [0], [0]>} : vector<8x1x16xf32>, vector<8x16x32xf32>, vector<8x1x32xf32> -> vector<8x1x32xf32>
    "tpu.trace_stop"() : () -> ()
    %41 = vector.shape_cast %40 : vector<8x1x32xf32> to vector<8x32xf32>
    %c0_23 = arith.constant 0 : index
    %c0_24 = arith.constant 0 : index
    %42 = vector.load %arg9[%c0_23, %c0_24] : memref<8x32xf32, #tpu.memory_space<vmem>>, vector<8x32xf32>
    tpu.vector_store %arg9[%c0_23, %c0_24], %41 {strides = array<i32>} : memref<8x32xf32, #tpu.memory_space<vmem>>, vector<8x32xf32>,
    return
  }
  func.func @transform_0(%arg0: i32) -> (i32, i32, i32) {
    %c0_i32 = arith.constant 0 : i32
    %c0_i32_0 = arith.constant 0 : i32
    %c0_i32_1 = arith.constant 0 : i32
    return %arg0, %c0_i32, %c0_i32_0 : i32, i32, i32
  }
  func.func @transform_1(%arg0: i32) -> (i32, i32) {
    %c0_i32 = arith.constant 0 : i32
    %c0_i32_0 = arith.constant 0 : i32
    return %arg0, %c0_i32 : i32, i32
  }
  func.func @transform_2(%arg0: i32) -> (i32, i32) {
    %c0_i32 = arith.constant 0 : i32
    %c0_i32_0 = arith.constant 0 : i32
    %c0_i32_1 = arith.constant 0 : i32
    return %c0_i32, %c0_i32_0 : i32, i32
  }
  func.func @transform_3(%arg0: i32) -> (i32, i32) {
    %c0_i32 = arith.constant 0 : i32
    %c0_i32_0 = arith.constant 0 : i32
    %c0_i32_1 = arith.constant 0 : i32
    return %c0_i32, %c0_i32_0 : i32, i32
  }
  func.func @transform_4(%arg0: i32) -> (i32, i32) {
    %c0_i32 = arith.constant 0 : i32
    %c0_i32_0 = arith.constant 0 : i32
    %c0_i32_1 = arith.constant 0 : i32
    return %c0_i32, %c0_i32_0 : i32, i32
  }
  func.func @transform_5(%arg0: i32) -> (i32, i32) {
    %c0_i32 = arith.constant 0 : i32
    %c0_i32_0 = arith.constant 0 : i32
    %c0_i32_1 = arith.constant 0 : i32
    return %c0_i32, %c0_i32_0 : i32, i32
  }
  func.func @transform_6(%arg0: i32) -> (i32, i32) {
    %c0_i32 = arith.constant 0 : i32
    %c0_i32_0 = arith.constant 0 : i32
    %c0_i32_1 = arith.constant 0 : i32
    return %c0_i32, %c0_i32_0 : i32, i32
  }
  func.func @transform_7(%arg0: i32) -> i32 {
    %c0_i32 = arith.constant 0 : i32
    %c0_i32_0 = arith.constant 0 : i32
    return %c0_i32 : i32
  }
  func.func @transform_8(%arg0: i32) -> (i32, i32) {
    %c0_i32 = arith.constant 0 : i32
    %c0_i32_0 = arith.constant 0 : i32
    return %arg0, %c0_i32 : i32, i32
  }
  func.func @transform_9(%arg0: i32) -> (i32, i32) {
    %c0_i32 = arith.constant 0 : i32
    %c0_i32_0 = arith.constant 0 : i32
    return %arg0, %c0_i32 : i32, i32
  }
}

</mosaic_0001>

<bundles_post_ra>
// kernel: attention_forward.1
= control target key start
LH: loop header
LB: loop body
LE: loop exit
PB: predicated region body
PF: predicated region fallthrough
CT: control target
= control target key end

     0   :  { %s2580_s0 = inlined_call_operand.hbm [shape: f32[16,16,32], index: 0, kind: input, shape index: {}]   ;;  %s2581_s1 = inlined_call_operand.hbm [shape: f32[16,32], index: 1, kind: input, shape index: {}]   ;;  %s2582_s2 = inlined_call_operand.hbm [shape: f32[32,32], index: 2, kind: input, shape index: {}]   ;;  %s2583_s3 = inlined_call_operand.vmem [shape: f32[1,32], index: 3, kind: input, shape index: {}]   ;;  %s2584_s4 = inlined_call_operand.hbm [shape: f32[32,32], index: 4, kind: input, shape index: {}]   ;;  %s2585_s5 = inlined_call_operand.vmem [shape: f32[1,32], index: 5, kind: input, shape index: {}]   ;;  %s2586_s6 = inlined_call_operand.vmem [shape: f32[1,32], index: 6, kind: input, shape index: {}]   ;;  %s2587_s7 = inlined_call_operand.<no memory space> [shape: f32[1], index: 7, kind: input, shape index: {}]   ;;  %s2588_s8 = inlined_call_operand.hbm [shape: f32[16,32], index: 8, kind: output, shape index: {0}]   ;;  %s2589_s9 = inlined_call_operand.hbm [shape: f32[16,16], index: 9, kind: output, shape index: {1}]  }
   0x1   :  { %2597 = sst [smem:[#allocation25_spill]] %s2582_s2 }
   0x2   :  { %2598 = sst [smem:[#allocation26_spill]] %s2584_s4 }
   0x3   :  { %15 = sst [smem:[#allocation2]] %s2587_s7 }
   0x4   :  { %16 = vsyncpa [#allocation4], 0 }
   0x5   :  { %18 = vsyncpa [#allocation4 + $0x1], 0 }
   0x6   :  { %19 = vsyncpa [#allocation7], 0 }
   0x7   :  { %21 = vsyncpa [#allocation7 + $0x1], 0 }
   0x8   :  { %22 = vsyncpa [#allocation10], 0 }
   0x9   :  { %23 = vsyncpa [#allocation5], 0 }
   0xa   :  { %25 = vsyncpa [#allocation5 + $0x1], 0 }
   0xb   :  { %26 = vsyncpa [#allocation13], 0 }
   0xc   :  { %28 = vsyncpa [#allocation13 + $0x1], 0  ;;  %s1991_s11 = smov 0   ;;  %s1993_s12 = smov 0  }
   0xd   :  { %s1995_s13 = smov 0   ;;  %s1997_s14 = smov 0  }
   0xe LB: > { %2599 = sst [smem:[#allocation20_spill]] %s1919_s11  ;;  %s2012_s7 = sadd.s32 4294967295, %s1931_s14   ;;  %s1931_s14 = sphi %s1997_s14, %s2616_s14   ;;  %s1927_s13 = sphi %s1995_s13, %s2618_s13   ;;  %s1923_s12 = sphi %s1993_s12, %s2620_s12   ;;  %s1919_s11 = sphi %s1991_s11, %s2619_s11  }
   0xf   : > { %2600 = sst [smem:[#allocation21_spill]] %s1927_s13  ;;  %s1518_s15 = sadd.s32 4294967294, %s1931_s14  }
  0x10   : > { %p54_p0 = scmp.ne.s32.totalorder %s1923_s12, %s1919_s11  ;;  %p55_p1 = scmp.eq.s32.totalorder %s2012_s7, 0 }
  0x11   : > { %p230_p2 = scmp.eq.s32.totalorder %s2012_s7, 1  ;;  %p236_p3 = scmp.eq.s32.totalorder %s1518_s15, 1 }
  0x12   : > { %p2021_p4 = por %p55_p1, %p54_p0  ;;  %p1519_p5 = scmp.ge.s32.totalorder %s1931_s14, 1 }
  0x13   : > { %p2026_p6 = por %p236_p3, %p54_p0  ;;  %p269_p7 = scmp.lt.s32.totalorder %s1931_s14, 3 }
  0x14   : > { %s2604_s2 = sld [smem:[#allocation25_spill]]  ;;  %s1933_s22 = smov [#allocation8]  }
  0x15   : > { %s2602_s17 = scalar_select %p2026_p6, 1, 0 }
  0x16   : > { %p2034_p8 = pnand %p1519_p5, %p269_p7  ;;  %s282_s23 = sshll.u32 %s1933_s22, 4  ;;  %s283_s23 = int_to_ptr.vmem [resolvable:$true] %s282_s23 }
  0x17   : > { %2603 = sst [smem:[#allocation22_spill]] %s2602_s17  ;;  %s2590_s27 = smov 128  }
  0x18   : > { %p1597_p9 = pneg %p2034_p8  ;;  %s2606_s4 = sld [smem:[#allocation26_spill]] }
  0x19   : > { %s2591_s28 = smov 8   ;;  %s1936_s29 = smov [#allocation9]  }
  0x1a   : > { %s280_s20 = sshll.u32 %s2604_s2, 4  ;;  %p1598_p10 = pnand %p1597_p9, %p55_p1  ;;  %s281_s20 = int_to_ptr.hbm [resolvable:$true] %s280_s20 }
  0x1b   : > { %s299_s30 = sshll.u32 %s1936_s29, 4  ;;  %s2053_s10 = sadd.s32 1, %s1931_s14   ;;  %s300_s30 = int_to_ptr.vmem [resolvable:$true] %s299_s30 }
  0x1c   : > { %1600 = dma.hbm_to_vmem [thread:$0]  (!%p1598_p10), %s281_s20, 512, %s283_s23, [#allocation7], %s2590_s27, %s2590_s27, %s2591_s28  }
  0x1d   : > { %2607 = sst [smem:[#allocation23_spill]] %s2053_s10  ;;  %s41_s15 = sadd.s32 1, %s1927_s13 }
  0x1e   : > { %s297_s26 = sshll.u32 %s2606_s4, 4  ;;  %s38_s18 = ssub.s32 %s1931_s14, %s2053_s10  ;;  %s298_s26 = int_to_ptr.hbm [resolvable:$true] %s297_s26 }
  0x1f   : > { %1603 = dma.hbm_to_vmem [thread:$0]  (!%p1598_p10), %s298_s26, 512, %s300_s30, [#allocation10], %s2590_s27, %s2590_s27, %s2591_s28  }
  0x20   : > { %p48_p12 = scmp.ne.s32.totalorder %s1927_s13, %s1923_s12  ;;  %p39_p13 = scmp.eq.s32.totalorder %s38_s18, 0 }
  0x21   : > { %p49_p0 = scmp.eq.s32.totalorder %s1931_s14, 0  ;;  %p1620_p5 = scmp.lt.s32.totalorder %s1931_s14, 2 }
  0x22   : > { %p2063_p3 = por %p230_p2, %p48_p12  ;;  %s2072_s22 = sand.u32 1, %s1927_s13  }
  0x23   : > { %s2069_s20 = scalar_select %p39_p13, %s1927_s13, %s41_s15  }
  0x24   : > { %p50_p7 = por %p49_p0, %p48_p12  ;;  %s1523_s23 = sshll.u32 %s2072_s22, 7 }
  0x25   : > { %2609 = sst [smem:[#allocation24_spill]] %s2069_s20  ;;  %s1568_s24 = sshll.u32 %s1931_s14, 7 }
  0x26   : > { %s332_s29 = scalar_lea.hbm %s2580_s0, %s1568_s24  ;;  %s326_s30 = scalar_lea.vmem [#allocation3], %s1523_s23 }
  0x27   : > { %s335_s18 = sshll.u32 %s326_s30, 4  ;;  %s333_s27 = sshll.u32 %s332_s29, 4  ;;  %s336_s18 = int_to_ptr.vmem [resolvable:$true] %s335_s18  ;;  %s334_s27 = int_to_ptr.hbm [resolvable:$true] %s333_s27 }
  0x28   : > { %p2079_p2 = pnand %p1620_p5, %p50_p7  ;;  %s345_s28 = sand.u32 1, %s1931_s14  }
  0x29   : > { %s1527_s2 = sshll.u32 %s2072_s22, 3  ;;  %s323_s4 = scalar_lea.sflag [#allocation4], %s2072_s22 }
  0x2a   : > { %s1761_s20 = sshra.s32 %s334_s27, 4  ;;  %p1765_p10 = pneg %p2079_p2  ;;  %s1762_s20 = int_to_ptr.hbm [resolvable:$true] %s1761_s20 }
  0x2b   : > { %s1763_s13 = scalar_lea.hbm %s1762_s20, 128  ;;  %s1768_s25 = scalar_lea.hbm %s2580_s0, 256 }
  0x2c   : > { %p1764_p9 = scmp.ne.s32.totalorder %s1762_s20, %s1763_s13  ;;  %p1769_p0 = scmp.lt.s32.totalorder %s1762_s20, %s2580_s0 }
  0x2d   : > { %p1770_p5 = scmp.lt.s32.totalorder %s1768_s25, %s1763_s13 }
  0x2e   : > { %p1766_p12 = pnand %p1765_p10, %p1764_p9 }
  0x2f   : > { %p1771_p7 = por %p1770_p5, %p1769_p0 }
  0x30   : > { %p1767_p13 = pneg %p1766_p12 }
  0x32   : > { %p1772_p11 = pnand %p1771_p7, %p1767_p13 }
  0x34   : > { %1775 = shalt.err (!%p1772_p11)
}
  0x35   : > { %s2611_s22 = smov 8   ;;  %s2612_s30 = smov 128  }
  0x36   : > { %1607 = dma.hbm_to_vmem [thread:$0]  (!%p2079_p2), %s334_s27, 2048, %s336_s18, %s323_s4, %s2612_s30, %s2612_s30, %s2611_s22  }
  0x37   : > { %s1528_s10 = sshll.u32 %s1931_s14, 3  ;;  %s349_s11 = scalar_lea.vmem [#allocation6], %s1527_s2 }
  0x38   : > { %s353_s24 = scalar_lea.hbm %s2581_s1, %s1528_s10  ;;  %s357_s26 = sshll.u32 %s349_s11, 4  ;;  %s358_s26 = int_to_ptr.vmem [resolvable:$true] %s357_s26 }
  0x39   : > { %s355_s20 = sshll.u32 %s353_s24, 4  ;;  %s346_s13 = scalar_lea.sflag [#allocation7], %s345_s28  ;;  %s356_s20 = int_to_ptr.hbm [resolvable:$true] %s355_s20 }
  0x3a   : > { %s1791_s25 = sshra.s32 %s356_s20, 4  ;;  %s1798_s18 = scalar_lea.hbm %s2581_s1, 16  ;;  %s1792_s25 = int_to_ptr.hbm [resolvable:$true] %s1791_s25 }
  0x3b   : > { %s1793_s29 = scalar_lea.hbm %s1792_s25, 8  ;;  %p1799_p13 = scmp.lt.s32.totalorder %s1792_s25, %s2581_s1 }
  0x3c   : > { %p1794_p11 = scmp.ne.s32.totalorder %s1792_s25, %s1793_s29  ;;  %p1800_p0 = scmp.lt.s32.totalorder %s1798_s18, %s1793_s29 }
  0x3e   : > { %p1796_p9 = pnand %p1794_p11, %p1765_p10  ;;  %p1801_p5 = por %p1800_p0, %p1799_p13 }
  0x40   : > { %p1797_p12 = pneg %p1796_p9 }
  0x42   : > { %p1802_p7 = pnand %p1801_p5, %p1797_p12 }
  0x44   : > { %1805 = shalt.err (!%p1802_p7)
}
  0x45   : > { %1610 = dma.hbm_to_vmem [thread:$0]  (!%p2079_p2), %s356_s20, 128, %s358_s26, %s346_s13  }
  0x46   : > { %366 = sbr.rel (%p2034_p8) target bundleno = 1150 (0x47e), region = 52  ;;  %s2120_s2 = sand.u32 (!%p2034_p8), 1, %s1923_s12  }
  0x47   : > { %s1530_s11 = sshll.u32 (!%p2034_p8), %s2120_s2, 7  ;;  %s369_s28 = scalar_lea.sflag (!%p2034_p8), [#allocation4], %s2120_s2 }
  0x48   : > { %s2124_s22 = scalar_lea.vmem (!%p2034_p8), [#allocation3], %s1530_s11 }
  0x4b   : > { %1894 = dma.done.wait (%p2021_p4), %s369_s28, 2048  }
  0x4c   : > { %1896 = vsyncadd (%p2021_p4), %s369_s28, 4294965248  ;;  %s378_s21 = sand.u32 1, %s2012_s7   ;;  %s2132_s15 = sshll.u32 %s2120_s2, 3 }
  0x4d   : > { %s379_s30 = scalar_lea.sflag [#allocation7], %s378_s21  ;;  %s382_s23 = scalar_lea.vmem [#allocation6], %s2132_s15 }
  0x4e   : > { %1898 = dma.done.wait (%p2021_p4), %s379_s30, 128  }
  0x4f   : > { %1900 = vsyncadd (%p2021_p4), %s379_s30, 4294967168 }
  0x50   : > { %1902 = dma.done.wait (%p55_p1), [#allocation7], 512  }
  0x51   : > { %1904 = vsyncadd (%p55_p1), [#allocation7], 4294966784 }
  0x52   : > { %1906 = dma.done.wait (%p55_p1), [#allocation10], 512  }
  0x53   : > { %1908 = vsyncadd (%p55_p1), [#allocation10], 4294966784  ;;  %v458_v0 = vld [vmem:[#allocation8 + $0x18] sm:$0xff]  ;;  %v457_v1 = vld [vmem:[#allocation8 + $0x10] sm:$0xff]  ;;  %vm459_vm0 = vcmask 261120   ;;  %s749_s29 = sld [smem:[#allocation2]] }
  0x54   : > { %520 = vmatpush.msra.mxu0 %v458_v0  ;;  %1569 = vmatpush.msra.mxu1 %v458_v0  ;;  %v456_v2 = vld [vmem:[#allocation8 + $0x8] sm:$0xff]  ;;  %v455_v3 = vld [vmem:[#allocation8] sm:$0xff]  ;;  %v439_v4 = vld [vmem:[%s2124_s22] sm:$0xff]  ;;  %vm788_vm1 = vcmask 130112   ;;  %vm811_vm2 = vcmask 1041409   ;;  %vm813_vm3 = vcmask 1042434  }
  0x55   : > { %1570 = vmatpush.msra.mxu2 %v458_v0  ;;  %1571 = vmatpush.msra.mxu3 %v458_v0  ;;  %v446_v5 = vld [vmem:[%s2124_s22 + $0x38] sm:$0xff]  ;;  %v597_v6 = vld [vmem:[#allocation9 + $0x18] sm:$0xff]  ;;  %v596_v8 = vld [vmem:[#allocation9 + $0x10] sm:$0xff]  ;;  %vm815_vm4 = vcmask 1043459   ;;  %vm817_vm5 = vcmask 1044484   ;;  %vm819_vm6 = vcmask 1045509  }
  0x56   : > { %521 = vmatpush.msra.mxu0 %v457_v1  ;;  %1572 = vmatpush.msra.mxu1 %v457_v1  ;;  %v2150_v7 = vld [vmem:[%s2124_s22 + $0x58] sm:$0xff]  ;;  %v440_v11 = vld [vmem:[%s2124_s22 + $0x8] sm:$0xff]  ;;  %v594_v13 = vld [vmem:[#allocation9] sm:$0xff]  ;;  %vm821_vm7 = vcmask 1046534   ;;  %vm823_vm8 = vcmask 1047559   ;;  %vm826_vm9 = vcmask 130048  }
  0x57   : > { %1573 = vmatpush.msra.mxu2 %v457_v1  ;;  %1574 = vmatpush.msra.mxu3 %v457_v1  ;;  %v454_v9 = vld [vmem:[%s2124_s22 + $0x78] sm:$0xff]  ;;  %v447_v14 = vld [vmem:[%s2124_s22 + $0x40] sm:$0xff]  ;;  %v441_v15 = vld [vmem:[%s2124_s22 + $0x10] sm:$0xff]  ;;  %s437_s4 = scalar_lea.vmem [#allocation12], %s2132_s15  ;;  %s1563_s27 = sshll.u32 %s2012_s7, 3 }
  0x58   : > { %522 = vmatpush.msra.mxu0 %v456_v2  ;;  %1575 = vmatpush.msra.mxu1 %v456_v2  ;;  %v595_v10 = vld [vmem:[#allocation9 + $0x8] sm:$0xff]  ;;  %v444_v16 = vld [vmem:[%s2124_s22 + $0x28] sm:$0xff]  ;;  %v2164_v17 = vld [vmem:[%s2124_s22 + $0x60] sm:$0xff]  ;;  %s1368_s10 = scalar_lea.hbm %s2589_s9, %s1563_s27  ;;  %s1370_s11 = sshll.u32 %s437_s4, 4  ;;  %s1371_s11 = int_to_ptr.vmem [resolvable:$true] %s1370_s11 }
  0x59   : > { %1576 = vmatpush.msra.mxu2 %v456_v2  ;;  %1577 = vmatpush.msra.mxu3 %v456_v2  ;;  %v442_v12 = vld [vmem:[%s2124_s22 + $0x18] sm:$0xff]  ;;  %v443_v18 = vld [vmem:[%s2124_s22 + $0x20] sm:$0xff]  ;;  %v448_v19 = vld [vmem:[%s2124_s22 + $0x48] sm:$0xff]  ;;  %s1372_s28 = sshll.u32 %s1368_s10, 4  ;;  %s1841_s24 = scalar_lea.hbm %s2589_s9, 16  ;;  %s1373_s28 = int_to_ptr.hbm [resolvable:$true] %s1372_s28 }
  0x5a   : > { %523 = vmatpush.msra.mxu0 %v455_v3  ;;  %1578 = vmatpush.msra.mxu1 %v455_v3  ;;  %v445_v20 = vld [vmem:[%s2124_s22 + $0x30] sm:$0xff]  ;;  %v2174_v21 = vld [vmem:[%s2124_s22 + $0x68] sm:$0xff]  ;;  %v1665_v34 = vld [vmem:[%s2585_s5] ss:$0 sm:$0xff]  ;;  %s1835_s21 = sshra.s32 %s1373_s28, 4  ;;  %s1836_s21 = int_to_ptr.hbm [resolvable:$true] %s1835_s21 }
  0x5b   : > { %1536 = vmatmul.msk.f32.vlgmr.msra.gmra.mxu0 %vm459_vm0, %v439_v4  ;;  %1543 = vmatmul.msk.f32.vlgmr.msra.gmra.mxu1 %vm459_vm0, %v446_v5  ;;  %v2181_v22 = vld [vmem:[%s2124_s22 + $0x50] sm:$0xff]  ;;  %v593_v24 = vld [vmem:[%s382_s23] sm:$0xff]  ;;  %s1837_s30 = scalar_lea.hbm %s1836_s21, 8  ;;  %p1842_p2 = scmp.lt.s32.totalorder %s1836_s21, %s2589_s9 }
  0x5c   : > { %617 = vmatpush.msrb.mxu1 %v597_v6  ;;  %1579 = vmatpush.msra.mxu2 %v455_v3  ;;  %v453_v23 = vld [vmem:[%s2124_s22 + $0x70] sm:$0xff]  ;;  %v2202_v36 = vld [vmem:[%s2583_s3] ss:$0 sm:$0xff]  ;;  %s1344_s22 = scalar_lea.sflag [#allocation13], %s2120_s2  ;;  %p1838_p1 = scmp.ne.s32.totalorder %s1836_s21, %s1837_s30 }
  0x5d   : > { %1547 = vmatmul.msk.f32.vlgmr.msra.gmra.mxu2 %vm459_vm0, %v2150_v7  ;;  %1580 = vmatpush.msra.mxu3 %v455_v3  ;;  %v2217_v49 = vld [vmem:[%s2586_s6] ss:$0 sm:$0xff]  ;;  %p1843_p10 = scmp.lt.s32.totalorder %s1841_s24, %s1837_s30 }
  0x5e   : > { %618 = vmatpush.msrb.mxu1 %v596_v8  ;;  %1551 = vmatmul.msk.f32.vlgmr.msra.gmra.mxu3 %vm459_vm0, %v454_v9  ;;  %p1839_p4 = pnand %p1838_p1, %p2063_p3 }
  0x5f   : > { %1154 = vmatpush.msrb.mxu2 %v440_v11  ;;  %1176 = vmatpush.msrb.mxu3 %v442_v12  ;;  %p1844_p11 = por %p1843_p10, %p1842_p2 }
  0x60   : > { %619 = vmatpush.msrb.mxu1 %v595_v10  ;;  %p1840_p8 = pneg %p1839_p4 }
  0x61   : > { %1155 = vmatpush.msrb.mxu2 %v439_v4  ;;  %1177 = vmatpush.msrb.mxu3 %v441_v15 }
  0x62   : > { %620 = vmatpush.msrb.mxu1 %v594_v13  ;;  %p1845_p9 = pnand %p1844_p11, %p1840_p8 }
  0x63   : > { %1198 = vmatpush.msra.mxu2 %v444_v16  ;;  %1537 = vmatmul.msk.f32.gmra.mxu0 %vm459_vm0, %v440_v11 }
  0x64   : > { %1544 = vmatmul.msk.f32.gmra.mxu1 %vm459_vm0, %v447_v14  ;;  %1220 = vmatpush.msra.mxu3 %v446_v5 }
  0x65   : > { %1199 = vmatpush.msra.mxu2 %v443_v18  ;;  %1242 = vmatpush.msra.mxu1 %v448_v19 }
  0x66   : > { %1548 = vmatmul.msk.f32.gmra.mxu2 %vm459_vm0, %v2164_v17  ;;  %1221 = vmatpush.msra.mxu3 %v445_v20 }
  0x67   : > { %1243 = vmatpush.msra.mxu1 %v447_v14 }
  0x6b   : > { %1538 = vmatmul.msk.f32.gmra.mxu0 %vm459_vm0, %v441_v15 }
  0x6c   : > { %1545 = vmatmul.msk.f32.gmra.mxu1 %vm459_vm0, %v448_v19 }
  0x6e   : > { %1549 = vmatmul.msk.f32.gmra.mxu2 %vm459_vm0, %v2174_v21 }
  0x73   : > { %1539 = vmatmul.msk.f32.gmra.mxu0 %vm459_vm0, %v442_v12 }
  0x74   : > { %1546 = vmatmul.msk.f32.gmra.mxu1 %vm459_vm0, %v2181_v22 }
  0x76   : > { %1550 = vmatmul.msk.f32.gmra.mxu2 %vm459_vm0, %v453_v23 }
  0x7b   : > { %1540 = vmatmul.msk.f32.gmra.mxu0 %vm459_vm0, %v443_v18 }
  0x7c   : > { %1552 = vmatmul.msk.f32.vlgmr.msrb.gmra.mxu1 %vm459_vm0, %v593_v24 }
  0x7d   : > { %1308 = vmatpush.msrb.mxu1 %v454_v9 }
  0x7f   : > { %1309 = vmatpush.msrb.mxu1 %v453_v23 }
  0x83   : > { %1541 = vmatmul.msk.f32.gmra.mxu0 %vm459_vm0, %v444_v16 }
  0x8b   : > { %1542 = vmatmul.msk.f32.gmra.mxu0 %vm459_vm0, %v445_v20 }
  0xd8   : > { %v525_v25 = vpop.f32.mrf.mxu0  ;;  %v546_v26 = vpop.f32.mrf.mxu1 }
  0xd9   : > { %v577_v38 = vadd.f32 %v2202_v36, %v525_v25  ;;  %v584_v20 = vadd.f32 %v2202_v36, %v546_v26 }
  0xe0   : > { %v528_v27 = vpop.f32.mrf.mxu0  ;;  %v558_v33 = vpop.f32.mrf.mxu2 }
  0xe1   : > { %v549_v28 = vpop.f32.mrf.mxu1  ;;  %v578_v43 = vadd.f32 %v2202_v36, %v528_v27  ;;  %v588_v6 = vadd.f32 %v2202_v36, %v558_v33 }
  0xe2   : > { %v585_v56 = vadd.f32 %v2202_v36, %v549_v28 }
  0xe8   : > { %v531_v29 = vpop.f32.mrf.mxu0 }
  0xe9   : > { %v552_v30 = vpop.f32.mrf.mxu1  ;;  %v579_v46 = vadd.f32 %v2202_v36, %v531_v29  ;;  %v561_v51 = vpop.f32.mrf.mxu2 }
  0xea   : > { %v586_v8 = vadd.f32 %v2202_v36, %v552_v30  ;;  %v589_v29 = vadd.f32 %v2202_v36, %v561_v51 }
  0xf0   : > { %v534_v32 = vpop.f32.mrf.mxu0 }
  0xf1   : > { %v2194_v31 = vpop.f32.mrf.mxu1  ;;  %v580_v57 = vadd.f32 %v2202_v36, %v534_v32  ;;  %v564_v23 = vpop.f32.mrf.mxu2 }
  0xf8   : > { %v537_v39 = vpop.f32.mrf.mxu0 }
  0xf9   : > { %v622_v35 = vpop.f32.mrf.mxu1  ;;  %v581_v44 = vadd.f32 %v2202_v36, %v537_v39 }
  0xfa   : > { %v2204_v37 = vadd.f32 %v1665_v34, %v622_v35 }
  0xfc   : > { %v627_v40 = vrot.slane %v2204_v37, 2  ;;  %v633_v41 = vperm.slane %v2204_v37, 0  ;;  %v626_v42 = vrot.slane %v2204_v37, 1  ;;  %v629_v45 = vrot.slane %v2204_v37, 4 }
  0xfd   : > { %v628_v60 = vrot.slane %v2204_v37, 3  ;;  %v630_v61 = vrot.slane %v2204_v37, 5  ;;  %v631_v19 = vrot.slane %v2204_v37, 6 }
  0xfe   : > { %v635_v47 = vperm.slane %v627_v40, 0  ;;  %v649_v48 = vadd.f32 %v633_v41, %v577_v38  ;;  %v634_v50 = vperm.slane %v626_v42, 0  ;;  %v637_v52 = vperm.slane %v629_v45, 0  ;;  %v567_v45 = vpop.f32.mrf.mxu2 }
  0xff   : > { %v650_v55 = vadd.f32 %v633_v41, %v578_v43  ;;  %v636_v9 = vperm.slane %v628_v60, 0  ;;  %v638_v10 = vperm.slane %v630_v61, 0  ;;  %v639_v33 = vperm.slane %v631_v19, 0  ;;  %v570_v61 = vpop.f32.mrf.mxu3 }
 0x100   : > { %v665_v53 = vmax.f32 %v649_v48, 0.0  ;;  %v651_v54 = vadd.f32 %v634_v50, %v579_v46  ;;  %v653_v58 = vadd.f32 %v635_v47, %v581_v44  ;;  %v652_v0 = vadd.f32 %v634_v50, %v580_v57  ;;  %v540_v11 = vpop.f32.mrf.mxu0 }
 0x101   : > { %v657_v1 = vadd.f32 %v637_v52, %v585_v56  ;;  %v666_v3 = vmax.f32 %v650_v55, 0.0  ;;  %v658_v18 = vadd.f32 %v637_v52, %v586_v8  ;;  %v656_v27 = vadd.f32 %v636_v9, %v584_v20 }
 0x102   : > { %v685_v59 = vmul.f32 %v2217_v49, %v665_v53  ;;  %v667_v62 = vmax.f32 %v651_v54, 0.0  ;;  %v669_v63 = vmax.f32 %v653_v58, 0.0  ;;  %v668_v14 = vmax.f32 %v652_v0, 0.0 }
 0x103   : > { %v673_v15 = vmax.f32 %v657_v1, 0.0  ;;  %v686_v16 = vmul.f32 %v2217_v49, %v666_v3  ;;  %v660_v28 = vadd.f32 %v638_v10, %v588_v6  ;;  %v674_v32 = vmax.f32 %v658_v18, 0.0 }
 0x104   : > { %v701_v2 = vsel %vm459_vm0, %v685_v59, 0.0  ;;  %v687_v4 = vmul.f32 %v2217_v49, %v667_v62  ;;  %v689_v5 = vmul.f32 %v2217_v49, %v669_v63  ;;  %v688_v24 = vmul.f32 %v2217_v49, %v668_v14 }
 0x105   : > { %702 = vadd.xlane.f32.xlu0 %v701_v2  ;;  %v693_v25 = vmul.f32 %v2217_v49, %v673_v15  ;;  %v704_v30 = vsel %vm459_vm0, %v686_v16, 0.0  ;;  %v582_v34 = vadd.f32 %v2202_v36, %v540_v11  ;;  %v672_v38 = vmax.f32 %v656_v27, 0.0 }
 0x106   : > { %v707_v12 = vsel %vm459_vm0, %v687_v4, 0.0  ;;  %v713_v13 = vsel %vm459_vm0, %v689_v5, 0.0  ;;  %v710_v35 = vsel %vm459_vm0, %v688_v24, 0.0  ;;  %v676_v39 = vmax.f32 %v660_v28, 0.0 }
 0x107   : > { %708 = vadd.xlane.f32.xlu1 %v707_v12  ;;  %714 = vadd.xlane.f32.xlu2 %v713_v13  ;;  %v725_v26 = vsel %vm459_vm0, %v693_v25, 0.0  ;;  %v694_v40 = vmul.f32 %v2217_v49, %v674_v32  ;;  %v661_v41 = vadd.f32 %v639_v33, %v589_v29  ;;  %v587_v42 = vadd.f32 %v2202_v36, %v2194_v31 }
 0x108   : > { %v543_v43 = vpop.f32.mrf.mxu0  ;;  %v632_v44 = vrot.slane %v2204_v37, 7  ;;  %v654_v46 = vadd.f32 %v635_v47, %v582_v34  ;;  %v692_v48 = vmul.f32 %v2217_v49, %v672_v38  ;;  %v696_v50 = vmul.f32 %v2217_v49, %v676_v39 }
 0x109   : > { %v659_v51 = vadd.f32 %v638_v10, %v587_v42  ;;  %v583_v52 = vadd.f32 %v2202_v36, %v543_v43  ;;  %v728_v53 = vsel %vm459_vm0, %v694_v40, 0.0  ;;  %v677_v54 = vmax.f32 %v661_v41, 0.0 }
 0x10a   : > { %v590_v55 = vadd.f32 %v2202_v36, %v564_v23  ;;  %v591_v31 = vadd.f32 %v2202_v36, %v567_v45  ;;  %v640_v56 = vperm.slane %v632_v44, 0  ;;  %v670_v57 = vmax.f32 %v654_v46, 0.0 }
 0x10b   : > { %v722_v37 = vsel %vm459_vm0, %v692_v48, 0.0  ;;  %v734_v47 = vsel %vm459_vm0, %v696_v50, 0.0  ;;  %v675_v58 = vmax.f32 %v659_v51, 0.0  ;;  %v655_v59 = vadd.f32 %v636_v9, %v583_v52 }
 0x10c   : > { %v697_v60 = vmul.f32 %v2217_v49, %v677_v54  ;;  %v663_v62 = vadd.f32 %v640_v56, %v591_v31  ;;  %v690_v0 = vmul.f32 %v2217_v49, %v670_v57  ;;  %v662_v1 = vadd.f32 %v639_v33, %v590_v55 }
 0x10d   : > { %705 = vadd.xlane.f32.xlu0 %v704_v30  ;;  %v695_v63 = vmul.f32 %v2217_v49, %v675_v58  ;;  %v592_v2 = vadd.f32 %v2202_v36, %v570_v61  ;;  %v671_v3 = vmax.f32 %v655_v59, 0.0  ;;  %v783_v33 = vlaneseq }
 0x10e   : > { %v737_v4 = vsel %vm459_vm0, %v697_v60, 0.0  ;;  %v679_v5 = vmax.f32 %v663_v62, 0.0  ;;  %v716_v8 = vsel %vm459_vm0, %v690_v0, 0.0  ;;  %v678_v9 = vmax.f32 %v662_v1, 0.0 }
 0x10f   : > { %711 = vadd.xlane.f32.xlu1 %v710_v35  ;;  %726 = vadd.xlane.f32.xlu2 %v725_v26  ;;  %v731_v6 = vsel %vm459_vm0, %v695_v63, 0.0  ;;  %v664_v10 = vadd.f32 %v640_v56, %v592_v2  ;;  %v691_v11 = vmul.f32 %v2217_v49, %v671_v3  ;;  %v750_v34 = vstv %s749_s29 }
 0x110   : > { %v698_v12 = vmul.f32 %v2217_v49, %v678_v9  ;;  %v699_v13 = vmul.f32 %v2217_v49, %v679_v5  ;;  %v2268_v35 = vand.u32 127, %v783_v33 }
 0x111   : > { %v680_v36 = vmax.f32 %v664_v10, 0.0  ;;  %v719_v14 = vsel %vm459_vm0, %v691_v11, 0.0 }
 0x112   : > { %v740_v15 = vsel %vm459_vm0, %v698_v12, 0.0  ;;  %v743_v16 = vsel %vm459_vm0, %v699_v13, 0.0 }
 0x113   : > { %v700_v18 = vmul.f32 %v2217_v49, %v680_v36  ;;  %v2273_v49 = vadd.s32 4294967288, %v2268_v35 }
 0x115   : > { %729 = vadd.xlane.f32.xlu0 %v728_v53  ;;  %v746_v19 = vsel %vm459_vm0, %v700_v18, 0.0 }
 0x117   : > { %723 = vadd.xlane.f32.xlu1 %v722_v37  ;;  %735 = vadd.xlane.f32.xlu2 %v734_v47 }
 0x11d   : > { %738 = vadd.xlane.f32.xlu0 %v737_v4 }
 0x11f   : > { %732 = vadd.xlane.f32.xlu1 %v731_v6  ;;  %717 = vadd.xlane.f32.xlu2 %v716_v8 }
 0x125   : > { %720 = vadd.xlane.f32.xlu0 %v719_v14 }
 0x127   : > { %741 = vadd.xlane.f32.xlu1 %v740_v15  ;;  %744 = vadd.xlane.f32.xlu2 %v743_v16 }
 0x12d   : > { %747 = vadd.xlane.f32.xlu0 %v746_v19 }
 0x178   : > { %v703_v20 = vpop.xlane.xlu0 %702 }
 0x179   : > { %v2279_v43 = vadd.f32 %v750_v34, %v703_v20 }
 0x17a   : > { %v709_v23 = vpop.xlane.xlu1 %708  ;;  %v715_v24 = vpop.xlane.xlu2 %714 }
 0x17b   : > { %v2277_v40 = vadd.f32 %v750_v34, %v709_v23  ;;  %v2281_v44 = vadd.f32 %v750_v34, %v715_v24  ;;  %v785_v54 = vperm.slane %v2279_v43, %v2268_v35 }
 0x17d   : > { %v790_v52 = vperm.slane %v2277_v40, %v2268_v35  ;;  %v793_v55 = vperm.slane %v2281_v44, %v2268_v35 }
 0x180   : > { %v706_v25 = vpop.xlane.xlu0 %705 }
 0x181   : > { %v2275_v39 = vadd.f32 %v750_v34, %v706_v25 }
 0x182   : > { %v712_v27 = vpop.xlane.xlu1 %711  ;;  %v727_v28 = vpop.xlane.xlu2 %726 }
 0x183   : > { %v2270_v38 = vadd.f32 %v750_v34, %v712_v27  ;;  %v787_v48 = vperm.slane %v2275_v39, %v2273_v49  ;;  %v2301_v31 = vadd.f32 %v750_v34, %v727_v28 }
 0x185   : > { %v791_v46 = vperm.slane %v2270_v38, %v2273_v49  ;;  %v789_v58 = vsel %vm788_vm1, %v787_v48, %v785_v54  ;;  %v799_v2 = vperm.slane %v2301_v31, %v2268_v35 }
 0x187   : > { %v792_v57 = vsel %vm788_vm1, %v791_v46, %v790_v52 }
 0x188   : > { %v730_v29 = vpop.xlane.xlu0 %729  ;;  %v812_v1 = vsel %vm811_vm2, %v792_v57, %v789_v58 }
 0x189   : > { %v2289_v50 = vadd.f32 %v750_v34, %v730_v29 }
 0x18a   : > { %v724_v30 = vpop.xlane.xlu1 %723  ;;  %v736_v32 = vpop.xlane.xlu2 %735 }
 0x18b   : > { %v2295_v53 = vadd.f32 %v750_v34, %v724_v30  ;;  %v800_v59 = vperm.slane %v2289_v50, %v2273_v49  ;;  %v2314_v62 = vadd.f32 %v750_v34, %v736_v32  ;;  %v1937_v32 = vmov 0  }
 0x18c   : > { %1663 = vset.pattern.permute.xlu1 %v1937_v32  ;;  %1662 = vset.pattern.permute.xlu0 %v1937_v32 }
 0x18d   : > { %v797_v61 = vperm.slane %v2295_v53, %v2273_v49  ;;  %v801_v10 = vsel %vm788_vm1, %v800_v59, %v799_v2  ;;  %v803_v13 = vperm.slane %v2314_v62, %v2273_v49  ;;  %1661 = vset.pattern.permute.xlu2 %v1937_v32 }
 0x190   : > { %v739_v26 = vpop.xlane.xlu0 %738 }
 0x191   : > { %v2321_v3 = vadd.f32 %v750_v34, %v739_v26 }
 0x192   : > { %v733_v41 = vpop.xlane.xlu1 %732  ;;  %v718_v42 = vpop.xlane.xlu2 %717 }
 0x193   : > { %v2283_v45 = vadd.f32 %v750_v34, %v718_v42  ;;  %v2304_v37 = vadd.f32 %v750_v34, %v733_v41  ;;  %v805_v15 = vperm.slane %v2321_v3, %v2268_v35 }
 0x195   : > { %v794_v51 = vperm.slane %v2283_v45, %v2273_v49  ;;  %v802_v6 = vperm.slane %v2304_v37, %v2268_v35 }
 0x197   : > { %v795_v60 = vsel %vm788_vm1, %v794_v51, %v793_v55  ;;  %v804_v18 = vsel %vm788_vm1, %v803_v13, %v802_v6 }
 0x198   : > { %v721_v56 = vpop.xlane.xlu0 %720  ;;  %v814_v8 = vsel %vm813_vm3, %v795_v60, %v812_v1 }
 0x199   : > { %v2306_v47 = vadd.f32 %v750_v34, %v721_v56 }
 0x19a   : > { %v742_v0 = vpop.xlane.xlu1 %741  ;;  %v745_v5 = vpop.xlane.xlu2 %744 }
 0x19b   : > { %v796_v63 = vperm.slane %v2306_v47, %v2268_v35  ;;  %v2323_v4 = vadd.f32 %v750_v34, %v742_v0  ;;  %v2335_v36 = vadd.f32 %v750_v34, %v745_v5 }
 0x19d   : > { %v798_v9 = vsel %vm788_vm1, %v797_v61, %v796_v63  ;;  %v806_v12 = vperm.slane %v2323_v4, %v2273_v49  ;;  %v808_v24 = vperm.slane %v2335_v36, %v2268_v35 }
 0x19e   : > { %v816_v11 = vsel %vm815_vm4, %v798_v9, %v814_v8 }
 0x19f   : > { %v818_v14 = vsel %vm817_vm5, %v801_v10, %v816_v11  ;;  %v807_v20 = vsel %vm788_vm1, %v806_v12, %v805_v15 }
 0x1a0   : > { %v748_v16 = vpop.xlane.xlu0 %747  ;;  %v820_v23 = vsel %vm819_vm6, %v804_v18, %v818_v14 }
 0x1a1   : > { %v2341_v19 = vadd.f32 %v750_v34, %v748_v16  ;;  %v822_v28 = vsel %vm821_vm7, %v807_v20, %v820_v23 }
 0x1a3   : > { %v809_v25 = vperm.slane %v2341_v19, %v2273_v49 }
 0x1a5   : > { %v810_v27 = vsel %vm788_vm1, %v809_v25, %v808_v24 }
 0x1a6   : > { %v824_v29 = vsel %vm823_vm8, %v810_v27, %v822_v28 }
 0x1a7   : > { %v827_v30 = vsel %vm826_vm9, %v824_v29, -inf }
 0x1a8   : > { %828 = vmax.xlane.f32.xlu1 %v827_v30 }
 0x21b   : > { %v2353_v33 = vpop.xlane.xlu1 %828 }
 0x21c   : > { %v832_v34 = vperm.slane %v2353_v33, 1  ;;  %v831_v26 = vperm.slane %v2353_v33, 0  ;;  %v833_v48 = vperm.slane %v2353_v33, 2  ;;  %v835_v51 = vperm.slane %v2353_v33, 4 }
 0x21d   : > { %v836_v59 = vperm.slane %v2353_v33, 5  ;;  %v838_v5 = vperm.slane %v2353_v33, 7  ;;  %v837_v12 = vperm.slane %v2353_v33, 6 }
 0x21e   : > { %v849_v41 = vsub.f32 %v2277_v40, %v832_v34  ;;  %v848_v42 = vsub.f32 %v2275_v39, %v831_v26  ;;  %v847_v46 = vsub.f32 %v2279_v43, %v831_v26  ;;  %v852_v56 = vsub.f32 %v2283_v45, %v833_v48 }
 0x21f   : > { %v855_v57 = vsub.f32 %v2301_v31, %v835_v51  ;;  %v850_v40 = vsub.f32 %v2270_v38, %v832_v34  ;;  %v834_v39 = vperm.slane %v2353_v33, 3  ;;  %v858_v31 = vsub.f32 %v2314_v62, %v836_v59 }
 0x220   : > { %v867_v52 = vmul.f32 1.442695, %v849_v41  ;;  %v865_v54 = vmul.f32 1.442695, %v848_v42  ;;  %v863_v55 = vmul.f32 1.442695, %v847_v46  ;;  %v851_v0 = vsub.f32 %v2281_v44, %v833_v48 }
 0x221   : > { %v873_v58 = vmul.f32 1.442695, %v852_v56  ;;  %v879_v43 = vmul.f32 1.442695, %v855_v57  ;;  %v869_v61 = vmul.f32 1.442695, %v850_v40  ;;  %v854_v38 = vsub.f32 %v2295_v53, %v834_v39 }
 0x222   : > { %1667 = vpow2.f32 %v867_v52  ;;  %v885_v2 = vmul.f32 1.442695, %v858_v31  ;;  %v871_v8 = vmul.f32 1.442695, %v851_v0  ;;  %v857_v62 = vsub.f32 %v2304_v37, %v836_v59 }
 0x223   : > { %1669 = vpow2.f32 %v865_v54  ;;  %v877_v1 = vmul.f32 1.442695, %v854_v38  ;;  %v861_v44 = vsub.f32 %v2335_v36, %v838_v5  ;;  %v853_v10 = vsub.f32 %v2306_v47, %v834_v39 }
 0x224   : > { %1671 = vpow2.f32 %v863_v55  ;;  %v883_v11 = vmul.f32 1.442695, %v857_v62  ;;  %v860_v36 = vsub.f32 %v2323_v4, %v837_v12  ;;  %v856_v47 = vsub.f32 %v2289_v50, %v835_v51 }
 0x225   : > { %1673 = vpow2.f32 %v873_v58  ;;  %v891_v13 = vmul.f32 1.442695, %v861_v44  ;;  %v875_v15 = vmul.f32 1.442695, %v853_v10  ;;  %v859_v4 = vsub.f32 %v2321_v3, %v837_v12 }
 0x226   : > { %1675 = vpow2.f32 %v879_v43  ;;  %v889_v18 = vmul.f32 1.442695, %v860_v36  ;;  %v881_v23 = vmul.f32 1.442695, %v856_v47  ;;  %v862_v29 = vsub.f32 %v2341_v19, %v838_v5 }
 0x227   : > { %1677 = vpow2.f32 %v869_v61  ;;  %v887_v50 = vmul.f32 1.442695, %v859_v4 }
 0x228   : > { %v2367_v60 = vpop.eup %1667  ;;  %1679 = vpow2.f32 %v877_v1  ;;  %v893_v30 = vmul.f32 1.442695, %v862_v29 }
 0x229   : > { %v2369_v63 = vpop.eup %1669  ;;  %918 = vperm.xlu1 %1663, %v2367_v60   ;;  %1681 = vpow2.f32 %v885_v2 }
 0x22a   : > { %v2372_v45 = vpop.eup %1671  ;;  %915 = vperm.xlu0 %1662, %v2369_v63   ;;  %1683 = vpow2.f32 %v871_v8 }
 0x22b   : > { %912 = vperm.xlu2 %1661, %v2372_v45   ;;  %v2380_v6 = vpop.eup %1673  ;;  %1685 = vpow2.f32 %v883_v11 }
 0x22c   : > { %v2382_v9 = vpop.eup %1675  ;;  %1687 = vpow2.f32 %v891_v13 }
 0x22d   : > { %v2385_v53 = vpop.eup %1677  ;;  %1689 = vpow2.f32 %v875_v15 }
 0x22e   : > { %v2393_v14 = vpop.eup %1679  ;;  %1691 = vpow2.f32 %v889_v18 }
 0x22f   : > { %v2395_v16 = vpop.eup %1681  ;;  %1693 = vpow2.f32 %v881_v23 }
 0x230   : > { %v2398_v37 = vpop.eup %1683  ;;  %1695 = vpow2.f32 %v887_v50 }
 0x231   : > { %927 = vperm.xlu1 %1663, %v2380_v6   ;;  %v2404_v20 = vpop.eup %1685  ;;  %1697 = vpow2.f32 %v893_v30 }
 0x232   : > { %936 = vperm.xlu0 %1662, %v2382_v9   ;;  %v2406_v24 = vpop.eup %1687 }
 0x233   : > { %921 = vperm.xlu2 %1661, %v2385_v53   ;;  %v2409_v25 = vpop.eup %1689 }
 0x234   : > { %v2414_v27 = vpop.eup %1691 }
 0x235   : > { %v2417_v28 = vpop.eup %1693 }
 0x236   : > { %v2421_v32 = vpop.eup %1695 }
 0x237   : > { %v2424_v33 = vpop.eup %1697 }
 0x239   : > { %933 = vperm.xlu1 %1663, %v2393_v14  }
 0x23a   : > { %945 = vperm.xlu0 %1662, %v2395_v16  }
 0x23b   : > { %924 = vperm.xlu2 %1661, %v2398_v37  }
 0x241   : > { %942 = vperm.xlu1 %1663, %v2404_v20  }
 0x242   : > { %954 = vperm.xlu0 %1662, %v2406_v24  }
 0x243   : > { %930 = vperm.xlu2 %1661, %v2409_v25  }
 0x249   : > { %951 = vperm.xlu1 %1663, %v2414_v27  }
 0x24b   : > { %939 = vperm.xlu2 %1661, %v2417_v28  }
 0x253   : > { %948 = vperm.xlu2 %1661, %v2421_v32  }
 0x25b   : > { %957 = vperm.xlu2 %1661, %v2424_v33  }
 0x285   : > { %v913_v3 = vpop.permute.xlu2 %912 }
 0x286   : > { %v959_v58 = vperm.slane %v913_v3, %v2268_v35 }
 0x28d   : > { %v922_v34 = vpop.permute.xlu2 %921 }
 0x28e   : > { %v963_v39 = vperm.slane %v922_v34, %v2273_v49 }
 0x295   : > { %v925_v26 = vpop.permute.xlu2 %924 }
 0x296   : > { %v965_v61 = vperm.slane %v925_v26, %v2268_v35 }
 0x29b   : > { %v919_v41 = vpop.permute.xlu1 %918 }
 0x29c   : > { %v916_v42 = vpop.permute.xlu0 %915  ;;  %v962_v56 = vperm.slane %v919_v41, %v2268_v35 }
 0x29d   : > { %v931_v46 = vpop.permute.xlu2 %930  ;;  %v960_v57 = vperm.slane %v916_v42, %v2273_v49 }
 0x29e   : > { %v964_v38 = vsel %vm788_vm1, %v963_v39, %v962_v56  ;;  %v968_v0 = vperm.slane %v931_v46, %v2268_v35 }
 0x29f   : > { %v961_v31 = vsel %vm788_vm1, %v960_v57, %v959_v58 }
 0x2a0   : > { %v983_v8 = vsel %vm811_vm2, %v964_v38, %v961_v31 }
 0x2a3   : > { %v928_v48 = vpop.permute.xlu1 %927 }
 0x2a4   : > { %v937_v51 = vpop.permute.xlu0 %936  ;;  %v966_v40 = vperm.slane %v928_v48, %v2273_v49 }
 0x2a5   : > { %v940_v52 = vpop.permute.xlu2 %939  ;;  %v971_v62 = vperm.slane %v937_v51, %v2268_v35 }
 0x2a6   : > { %v967_v1 = vsel %vm788_vm1, %v966_v40, %v965_v61  ;;  %v972_v44 = vperm.slane %v940_v52, %v2273_v49 }
 0x2a7   : > { %v984_v12 = vsel %vm813_vm3, %v967_v1, %v983_v8 }
 0x2a8   : > { %v973_v4 = vsel %vm788_vm1, %v972_v44, %v971_v62 }
 0x2ab   : > { %v934_v19 = vpop.permute.xlu1 %933 }
 0x2ac   : > { %v946_v54 = vpop.permute.xlu0 %945  ;;  %v969_v43 = vperm.slane %v934_v19, %v2273_v49 }
 0x2ad   : > { %v949_v55 = vpop.permute.xlu2 %948  ;;  %v975_v13 = vperm.slane %v946_v54, %v2273_v49 }
 0x2ae   : > { %v970_v2 = vsel %vm788_vm1, %v969_v43, %v968_v0  ;;  %v977_v50 = vperm.slane %v949_v55, %v2268_v35 }
 0x2af   : > { %v985_v15 = vsel %vm815_vm4, %v970_v2, %v984_v12 }
 0x2b0   : > { %v986_v30 = vsel %vm817_vm5, %v973_v4, %v985_v15 }
 0x2b3   : > { %v943_v59 = vpop.permute.xlu1 %942 }
 0x2b4   : > { %v974_v5 = vperm.slane %v943_v59, %v2268_v35  ;;  %v955_v10 = vpop.permute.xlu0 %954 }
 0x2b5   : > { %v958_v11 = vpop.permute.xlu2 %957  ;;  %v980_v47 = vperm.slane %v955_v10, %v2268_v35 }
 0x2b6   : > { %v976_v36 = vsel %vm788_vm1, %v975_v13, %v974_v5  ;;  %v981_v18 = vperm.slane %v958_v11, %v2273_v49 }
 0x2b7   : > { %v987_v34 = vsel %vm819_vm6, %v976_v36, %v986_v30 }
 0x2b8   : > { %v982_v26 = vsel %vm788_vm1, %v981_v18, %v980_v47 }
 0x2bb   : > { %v952_v23 = vpop.permute.xlu1 %951 }
 0x2bc   : > { %v978_v29 = vperm.slane %v952_v23, %v2273_v49 }
 0x2be   : > { %v979_v3 = vsel %vm788_vm1, %v978_v29, %v977_v50 }
 0x2bf   : > { %v988_v41 = vsel %vm821_vm7, %v979_v3, %v987_v34 }
 0x2c0   : > { %v989_v42 = vsel %vm823_vm8, %v982_v26, %v988_v41 }
 0x2c1   : > { %v991_v46 = vsel %vm826_vm9, %v989_v42, 0.0 }
 0x2c2   : > { %992 = vadd.xlane.f32.xlu1 %v991_v46 }
 0x335   : > { %v993_v48 = vpop.xlane.xlu1 %992 }
 0x336   : > { %1699 = vrcp.f32 %v993_v48  ;;  %v1005_v54 = vand.u32 2147483648, %v993_v48  ;;  %v1003_v56 = vand.u32 2147483647, %v993_v48  ;;  %vm999_vm11 = vweird.f32 %v993_v48 }
 0x338   : > { %v1006_v40 = vor.u32 1.1754944e-38, %v1005_v54  ;;  %vm1004_vm13 = vcmp.eq.f32.partialorder %v1003_v56, 8.507059e+37 }
 0x33c   : > { %v1700_v51 = vpop.eup %1699 }
 0x33d   : > { %v995_v52 = vmul.f32 %v1700_v51, %v993_v48  ;;  %vm1000_vm10 = vweird.f32 %v1700_v51 }
 0x33e   : > { %vm1001_vm12 = vmor %vm999_vm11, %vm1000_vm10 }
 0x33f   : > { %v996_v19 = vsub.f32 1.0, %v995_v52 }
 0x341   : > { %v997_v55 = vmul.f32 %v1700_v51, %v996_v19 }
 0x343   : > { %v998_v57 = vadd.f32 %v1700_v51, %v997_v55 }
 0x345   : > { %v1002_v58 = vsel %vm1001_vm12, %v1700_v51, %v998_v57 }
 0x346   : > { %v1007_v39 = vsel %vm1004_vm13, %v1006_v40, %v1002_v58 }
 0x347   : > { %v1014_v43 = vperm.slane %v1007_v39, 5  ;;  %v1009_v59 = vperm.slane %v1007_v39, 0  ;;  %v1010_v0 = vperm.slane %v1007_v39, 1  ;;  %v1011_v5 = vperm.slane %v1007_v39, 2 }
 0x348   : > { %v1013_v44 = vperm.slane %v1007_v39, 4  ;;  %v1015_v10 = vperm.slane %v1007_v39, 6  ;;  %v1016_v11 = vperm.slane %v1007_v39, 7 }
 0x349   : > { %v1035_v61 = vmul.f32 %v2404_v20, %v1014_v43  ;;  %v1026_v38 = vmul.f32 %v2369_v63, %v1009_v59  ;;  %v1025_v31 = vmul.f32 %v2372_v45, %v1009_v59  ;;  %v1028_v1 = vmul.f32 %v2385_v53, %v1010_v0 }
 0x34a   : > { %v1027_v2 = vmul.f32 %v2367_v60, %v1010_v0  ;;  %v1030_v8 = vmul.f32 %v2380_v6, %v1011_v5  ;;  %v1029_v62 = vmul.f32 %v2398_v37, %v1011_v5  ;;  %v1012_v63 = vperm.slane %v1007_v39, 3 }
 0x34b   : > { %1088 = vperm.xlu1 %1663, %v1035_v61   ;;  %1061 = vperm.xlu2 %1661, %v1026_v38   ;;  %v1034_v53 = vmul.f32 %v2417_v28, %v1013_v44  ;;  %v1033_v60 = vmul.f32 %v2382_v9, %v1013_v44  ;;  %v1037_v6 = vmul.f32 %v2421_v32, %v1015_v10 }
 0x34c   : > { %1058 = vperm.xlu0 %1662, %v1025_v31   ;;  %v1032_v45 = vmul.f32 %v2393_v14, %v1012_v63  ;;  %v1031_v20 = vmul.f32 %v2409_v25, %v1012_v63  ;;  %v1036_v37 = vmul.f32 %v2395_v16, %v1014_v43  ;;  %v1039_v14 = vmul.f32 %v2406_v24, %v1016_v11 }
 0x34d   : > { %v1038_v25 = vmul.f32 %v2414_v27, %v1015_v10  ;;  %v1040_v28 = vmul.f32 %v2424_v33, %v1016_v11 }
 0x353   : > { %1067 = vperm.xlu2 %1661, %v1028_v1  }
 0x354   : > { %1064 = vperm.xlu0 %1662, %v1027_v2  }
 0x35b   : > { %1073 = vperm.xlu2 %1661, %v1030_v8  }
 0x35c   : > { %1070 = vperm.xlu0 %1662, %v1029_v62  }
 0x363   : > { %1079 = vperm.xlu2 %1661, %v1032_v45  }
 0x364   : > { %1076 = vperm.xlu0 %1662, %v1031_v20  }
 0x36b   : > { %1085 = vperm.xlu2 %1661, %v1034_v53  }
 0x36c   : > { %1082 = vperm.xlu0 %1662, %v1033_v60  }
 0x373   : > { %1094 = vperm.xlu2 %1661, %v1037_v6  }
 0x374   : > { %1091 = vperm.xlu0 %1662, %v1036_v37  }
 0x37b   : > { %1100 = vperm.xlu2 %1661, %v1039_v14  }
 0x37c   : > { %1097 = vperm.xlu0 %1662, %v1038_v25  }
 0x384   : > { %1103 = vperm.xlu0 %1662, %v1040_v28  }
 0x3a5   : > { %v1062_v9 = vpop.permute.xlu2 %1061 }
 0x3a6   : > { %v1106_v15 = vperm.slane %v1062_v9, %v2273_v49 }
 0x3ad   : > { %v1068_v12 = vpop.permute.xlu2 %1067 }
 0x3ae   : > { %v1109_v27 = vperm.slane %v1068_v12, %v2273_v49 }
 0x3b5   : > { %v1074_v36 = vpop.permute.xlu2 %1073 }
 0x3b6   : > { %v1112_v23 = vperm.slane %v1074_v36, %v2273_v49 }
 0x3bd   : > { %v1080_v4 = vpop.permute.xlu2 %1079  ;;  %v1089_v42 = vpop.permute.xlu1 %1088 }
 0x3be   : > { %v1059_v13 = vpop.permute.xlu0 %1058  ;;  %v1115_v29 = vperm.slane %v1080_v4, %v2273_v49  ;;  %v1120_v48 = vperm.slane %v1089_v42, %v2268_v35 }
 0x3bf   : > { %v1105_v32 = vperm.slane %v1059_v13, %v2268_v35 }
 0x3c1   : > { %v1107_v16 = vsel %vm788_vm1, %v1106_v15, %v1105_v32 }
 0x3c2   : > { %1553 = vmatmul.msk.f32.vlgmr.msrb.gmra.mxu2 %vm826_vm9, %v1107_v16 }
 0x3c3   : > { %1264 = vmatpush.msrb.mxu2 %v2150_v7 }
 0x3c5   : > { %1265 = vmatpush.msrb.mxu2 %v2181_v22 }
 0x3c6   : > { %v1065_v24 = vpop.permute.xlu0 %1064 }
 0x3c7   : > { %v1108_v33 = vperm.slane %v1065_v24, %v2268_v35 }
 0x3c9   : > { %v1110_v47 = vsel %vm788_vm1, %v1109_v27, %v1108_v33 }
 0x3ca   : > { %1554 = vmatmul.msk.f32.vlgmr.msrb.gmra.mxu3 %vm826_vm9, %v1110_v47  ;;  %v1129_v40 = vsel %vm811_vm2, %v1110_v47, %v1107_v16 }
 0x3cb   : > { %1286 = vmatpush.msrb.mxu3 %v2174_v21 }
 0x3cd   : > { %1287 = vmatpush.msrb.mxu3 %v2164_v17  ;;  %v1086_v17 = vpop.permute.xlu2 %1085 }
 0x3ce   : > { %v1071_v18 = vpop.permute.xlu0 %1070  ;;  %v1118_v34 = vperm.slane %v1086_v17, %v2273_v49 }
 0x3cf   : > { %v1111_v7 = vperm.slane %v1071_v18, %v2268_v35 }
 0x3d1   : > { %v1113_v22 = vsel %vm788_vm1, %v1112_v23, %v1111_v7 }
 0x3d2   : > { %1555 = vmatmul.msk.f32.vlgmr.msra.gmra.mxu2 %vm826_vm9, %v1113_v22  ;;  %v1130_v39 = vsel %vm813_vm3, %v1113_v22, %v1129_v40 }
 0x3d5   : > { %v1095_v19 = vpop.permute.xlu2 %1094 }
 0x3d6   : > { %v1077_v50 = vpop.permute.xlu0 %1076  ;;  %v1123_v55 = vperm.slane %v1095_v19, %v2268_v35 }
 0x3d7   : > { %v1114_v30 = vperm.slane %v1077_v50, %v2268_v35 }
 0x3d9   : > { %v1116_v3 = vsel %vm788_vm1, %v1115_v29, %v1114_v30 }
 0x3da   : > { %1556 = vmatmul.msk.f32.vlgmr.msra.gmra.mxu3 %vm826_vm9, %v1116_v3  ;;  %v1131_v43 = vsel %vm815_vm4, %v1116_v3, %v1130_v39 }
 0x3dd   : > { %v1101_v58 = vpop.permute.xlu2 %1100 }
 0x3de   : > { %v1083_v21 = vpop.permute.xlu0 %1082  ;;  %v1126_v61 = vperm.slane %v1101_v58, %v2268_v35 }
 0x3df   : > { %v1117_v26 = vperm.slane %v1083_v21, %v2268_v35 }
 0x3e1   : > { %v1119_v41 = vsel %vm788_vm1, %v1118_v34, %v1117_v26 }
 0x3e2   : > { %1557 = vmatmul.msk.f32.vlgmr.msra.gmra.mxu1 %vm826_vm9, %v1119_v41  ;;  %v1132_v38 = vsel %vm817_vm5, %v1119_v41, %v1131_v43 }
 0x3e6   : > { %v1092_v46 = vpop.permute.xlu0 %1091 }
 0x3e7   : > { %v1121_v51 = vperm.slane %v1092_v46, %v2273_v49 }
 0x3e9   : > { %v1122_v52 = vsel %vm788_vm1, %v1121_v51, %v1120_v48 }
 0x3ea   : > { %1558 = vmatmul.msk.f32.vlgmr.msrb.gmra.mxu2 %vm826_vm9, %v1122_v52  ;;  %v1133_v0 = vsel %vm819_vm6, %v1122_v52, %v1132_v38 }
 0x3ee   : > { %v1098_v54 = vpop.permute.xlu0 %1097 }
 0x3ef   : > { %v1124_v56 = vperm.slane %v1098_v54, %v2273_v49 }
 0x3f1   : > { %v1125_v57 = vsel %vm788_vm1, %v1124_v56, %v1123_v55 }
 0x3f2   : > { %1559 = vmatmul.msk.f32.vlgmr.msrb.gmra.mxu3 %vm826_vm9, %v1125_v57  ;;  %v1134_v1 = vsel %vm821_vm7, %v1125_v57, %v1133_v0 }
 0x3f6   : > { %v1104_v59 = vpop.permute.xlu0 %1103 }
 0x3f7   : > { %v1127_v31 = vperm.slane %v1104_v59, %v2273_v49 }
 0x3f9   : > { %v1128_v2 = vsel %vm788_vm1, %v1127_v31, %v1126_v61 }
 0x3fa   : > { %v1135_v5 = vsel %vm823_vm8, %v1128_v2, %v1134_v1  ;;  %1560 = vmatmul.msk.f32.vlgmr.msrb.gmra.mxu1 %vm826_vm9, %v1128_v2 }
 0x3fb   : > { %1137 = vst.msk [vmem:[%s437_s4] sm:$0xff] %vm826_vm9, %v1135_v5 }
 0x3fc   : > { %1848 = shalt.err (!%p1845_p9)
}
 0x3fd   : > { %1594 = dma.vmem_to_hbm [thread:$0]  (%p2063_p3), %s1371_s11, 128, %s1373_s28, %s1344_s22  }
 0x3fe   : > { %s1354_s29 = scalar_lea.hbm %s2588_s8, %s1563_s27  ;;  %s430_s4 = scalar_lea.vmem [#allocation11], %s2132_s15 }
 0x3ff   : > { %s1356_s18 = sshll.u32 %s430_s4, 4  ;;  %s1358_s17 = sshll.u32 %s1354_s29, 4  ;;  %s1357_s18 = int_to_ptr.vmem [resolvable:$true] %s1356_s18  ;;  %s1359_s17 = int_to_ptr.hbm [resolvable:$true] %s1358_s17 }
 0x400   : > { %s1339_s7 = scalar_lea.sflag [#allocation5], %s2120_s2  ;;  %s1863_s27 = sshra.s32 %s1359_s17, 4  ;;  %s1864_s27 = int_to_ptr.hbm [resolvable:$true] %s1863_s27 }
 0x401   : > { %s1865_s10 = scalar_lea.hbm %s1864_s27, 8  ;;  %s1869_s28 = scalar_lea.hbm %s2588_s8, 16 }
 0x402   : > { %p1866_p12 = scmp.ne.s32.totalorder %s1864_s27, %s1865_s10  ;;  %p1870_p5 = scmp.lt.s32.totalorder %s1864_s27, %s2588_s8 }
 0x403   : > { %p1871_p7 = scmp.lt.s32.totalorder %s1869_s28, %s1865_s10 }
 0x404   : > { %p1867_p13 = pnand %p1866_p12, %p2063_p3 }
 0x405   : > { %p1872_p1 = por %p1871_p7, %p1870_p5 }
 0x406   : > { %p1868_p0 = pneg %p1867_p13 }
 0x408   : > { %p1873_p4 = pnand %p1872_p1, %p1868_p0 }
 0x445   : > { %v1157_v35 = vpop.f32.mrf.mxu2 }
 0x44d   : > { %v1179_v49 = vpop.f32.mrf.mxu3 }
 0x44e   : > { %v1322_v63 = vrot.slane %v1179_v49, 7 }
 0x450   : > { %v1323_v60 = vsel %vm811_vm2, %v1322_v63, %v1157_v35 }
 0x455   : > { %v1201_v8 = vpop.f32.mrf.mxu2 }
 0x456   : > { %v1324_v45 = vrot.slane %v1201_v8, 6 }
 0x458   : > { %v1325_v10 = vsel %vm813_vm3, %v1324_v45, %v1323_v60 }
 0x45d   : > { %v1223_v62 = vpop.f32.mrf.mxu3 }
 0x45e   : > { %v1326_v20 = vrot.slane %v1223_v62, 5 }
 0x45f   : > { %v1245_v44 = vpop.f32.mrf.mxu1 }
 0x460   : > { %v1328_v6 = vrot.slane %v1245_v44, 4  ;;  %v1327_v37 = vsel %vm815_vm4, %v1326_v20, %v1325_v10 }
 0x462   : > { %v1329_v25 = vsel %vm817_vm5, %v1328_v6, %v1327_v37 }
 0x46d   : > { %v1267_v53 = vpop.f32.mrf.mxu2 }
 0x46e   : > { %v1330_v11 = vrot.slane %v1267_v53, 3 }
 0x470   : > { %v1331_v9 = vsel %vm819_vm6, %v1330_v11, %v1329_v25 }
 0x475   : > { %v1289_v14 = vpop.f32.mrf.mxu3 }
 0x476   : > { %v1332_v28 = vrot.slane %v1289_v14, 2 }
 0x477   : > { %v1311_v12 = vpop.f32.mrf.mxu1 }
 0x478   : > { %v1333_v13 = vsel %vm821_vm7, %v1332_v28, %v1331_v9  ;;  %v1334_v15 = vrot.slane %v1311_v12, 1 }
 0x47a   : > { %v1335_v32 = vsel %vm823_vm8, %v1334_v15, %v1333_v13 }
 0x47b   : > { %1337 = vst.msk [vmem:[%s430_s4] sm:$0xff] %vm459_vm0, %v1335_v32 }
 0x47c   : > { %1876 = shalt.err (!%p1873_p4)
}
 0x47d   : > { %1593 = dma.vmem_to_hbm [thread:$0]  (%p2063_p3), %s1357_s18, 128, %s1359_s17, %s1339_s7  }
 0x47e PF: > { %s2613_s2 = sld [smem:[#allocation20_spill]]  ;;  %p2615_p8 = scmp.ge.s32.totalorder %s1931_s14, 2 }
 0x480   : > { %p1612_p2 = pnand %p2615_p8, %p2026_p6 }
 0x482   : > { %p1613_p10 = pneg %p1612_p2 }
 0x484   : > { %s1384_s23 = sand.u32 1, %s2613_s2  }
 0x485   : > { %s1385_s16 = scalar_lea.sflag [#allocation5], %s1384_s23 }
 0x486   : > { %1910 = dma.done.wait (%p1613_p10), %s1385_s16, 128  }
 0x487   : > { %1912 = vsyncadd (%p1613_p10), %s1385_s16, 4294967168  ;;  %s1395_s24 = scalar_lea.sflag [#allocation13], %s1384_s23 }
 0x488   : > { %1914 = dma.done.wait (%p1613_p10), %s1395_s24, 128  }
 0x489   : > { %1916 = vsyncadd (%p1613_p10), %s1395_s24, 4294967168  ;;  %s2616_s14 = sld [smem:[#allocation23_spill]]  ;;  %s2619_s11 = smov %s1923_s12 }
 0x48a   : > { %s2617_s26 = sld [smem:[#allocation21_spill]] }
 0x48b   : > { %s2618_s13 = sld [smem:[#allocation24_spill]] }
 0x48f   : > { %p31_p3 = scmp.ge.s32.totalorder %s2616_s14, 4  }
 0x490   : > { %s2620_s12 = smov %s2617_s26 }
 0x491   :  { %33 = sbr.rel (!%p31_p3) target bundleno = 14 (0xe), region = 135 }
 0x496   :  { %1401 = vsyncpa [#allocation4], 1 }
 0x497   :  { %1403 = vsyncpa [#allocation4 + $0x1], 1 }
 0x498   :  { %1404 = vsyncpa [#allocation7], 1 }
 0x499   :  { %1406 = vsyncpa [#allocation7 + $0x1], 1 }
 0x49a   :  { %1407 = vsyncpa [#allocation10], 1 }
 0x49b   :  { %1408 = vsyncpa [#allocation5], 1 }
 0x49c   :  { %1410 = vsyncpa [#allocation5 + $0x1], 1 }
 0x49d   :  { %1411 = vsyncpa [#allocation13], 1 }
 0x49e   :  { %1413 = vsyncpa [#allocation13 + $0x1], 1 }

</bundles_post_ra>
